<compile_context>
chip_gen: v7x
topology: tpu7x:2x2x1
jax: 0.10.0
libtpu: 0.0.40
codegen_flags: <defaults>
</compile_context>

<pallas_src>
import jax
import jax.numpy as jnp
from jax.experimental import pallas as pl
from jax.experimental.pallas import tpu as pltpu


# ----------------------------- kernels ------------------------------------- #

def _gate_kernel_rows(bias_ref, orig_ref, add_ref, w_o_ref, w_a_ref, out_ref):
    """General path: one logical row per sublane row; tile = (tile_n, H)."""
    orig = orig_ref[...].astype(jnp.float32)             # (tile_n, H)
    add = add_ref[...].astype(jnp.float32)                # (tile_n, H)
    # Linear(2H -> 1) on concat([orig, add]) == fused per-half multiply-add,
    # then a single cross-lane reduction (one XLU reduce instead of two).
    s = orig * w_o_ref[...] + add * w_a_ref[...]          # (tile_n, H)
    logit = jnp.sum(s, axis=-1, keepdims=True) + bias_ref[0]
    gate = jax.nn.sigmoid(logit)                          # (tile_n, 1)
    out_ref[...] = (add + gate * (orig - add)).astype(out_ref.dtype)


def _gate_kernel_packed(bias_ref, orig_ref, add_ref, w_o_ref, w_a_ref, seg_ref,
                        out_ref):
    """Packed path: R = 128 // H logical rows per lane row; tile = (tile_p, 128)."""
    orig = orig_ref[...].astype(jnp.float32)              # (tile_p, 128)
    add = add_ref[...].astype(jnp.float32)                # (tile_p, 128)
    # Per-lane contribution to each logical row's logit (VPU).
    s = orig * w_o_ref[...] + add * w_a_ref[...]          # (tile_p, 128) f32
    # Block-diagonal segment-sum matmul (seg is 0/1, stored bf16): each logical
    # row's logit is summed over its own H lanes and replicated across them, so
    # the gate is already lane-aligned with the packed data.
    # v5e's MXU is bf16-only, so an f32 x f32 matmul would multi-pass and could
    # poke out from under the DMA; a 2-pass hi/lo bf16 split keeps near-f32
    # accuracy with two cheap single-pass bf16 matmuls (seg entries are exact).
    s_hi = s.astype(jnp.bfloat16)
    s_lo = (s - s_hi.astype(jnp.float32)).astype(jnp.bfloat16)
    seg = seg_ref[...]
    logit = (jnp.dot(s_hi, seg, preferred_element_type=jnp.float32)
             + jnp.dot(s_lo, seg, preferred_element_type=jnp.float32)
             + bias_ref[0])                               # (tile_p, 128)
    gate = jax.nn.sigmoid(logit)
    out_ref[...] = (add + gate * (orig - add)).astype(out_ref.dtype)


# ----------------------------- helpers -------------------------------------- #

def _buffered_supported() -> bool:
    """Probe whether BlockSpec(pipeline_mode=pl.Buffered(n)) exists on this jax."""
    if not hasattr(pl, "Buffered"):
        return False
    try:
        pl.BlockSpec((8, 128), lambda i: (i, 0), pipeline_mode=pl.Buffered(3))
    except Exception:
        return False
    return True


_BUFFERED_OK = _buffered_supported()


def _streaming_spec(block_shape, index_map, depth):
    """BlockSpec for a streamed array, optionally with deeper pipelining."""
    if depth is not None and depth > 2 and _BUFFERED_OK:
        return pl.BlockSpec(block_shape, index_map, pipeline_mode=pl.Buffered(depth))
    return pl.BlockSpec(block_shape, index_map)


def _sublane_multiple(itemsize: int) -> int:
    # 8 for f32, 16 for bf16, 32 for int8/fp8 (sublane packing).
    return 8 * max(1, 4 // max(1, itemsize))


def _round_up(x: int, m: int) -> int:
    return ((x + m - 1) // m) * m


def _round_down(x: int, m: int) -> int:
    return (x // m) * m


def _pick_tile_rows(n_rows: int, lane_width: int, itemsize: int, *,
                    vmem_budget_bytes: int, n_buffers: int) -> int:
    """Largest row tile whose live pipeline buffers fit the VMEM budget."""
    sub = _sublane_multiple(itemsize)
    if n_rows <= sub:
        return int(n_rows)                       # single full-extent block
    # Raised row cap (review): 8192 rows for f32, 16384 for bf16 (~4 MiB at
    # 128 lanes), so bigger blocks amortize the ~0.35 us per-step overhead.
    max_rows = (8192 * 4) // itemsize
    per_block_budget = vmem_budget_bytes // n_buffers
    tile = per_block_budget // (lane_width * itemsize)
    tile = max(sub, min(int(tile), max_rows, _round_down(n_rows, sub)))
    tile = _round_down(tile, sub)
    # v7x megacore: prefer an even number of grid steps so both TensorCores get
    # equal work on the "parallel" axis (odd step counts leave one TC a tail).
    steps = pl.cdiv(n_rows, tile)
    if steps % 2 == 1:
        cand = _round_up(pl.cdiv(n_rows, steps + 1), sub)
        if cand >= sub:
            tile = min(tile, cand)
    return int(tile)


# ----------------------------- wrapper -------------------------------------- #

def gate_net_pallas(orig_inp, add_inp, weight, bias, *,
                    vmem_budget_bytes=24 * 1024 * 1024):
    """orig_inp, add_inp: (..., H). weight: (1, 2H) [PyTorch Linear]. bias: (1,)."""
    assert orig_inp.shape == add_inp.shape
    H = orig_inp.shape[-1]
    assert weight.shape == (1, 2 * H)

    lead_shape = orig_inp.shape[:-1]
    out_dtype = orig_inp.dtype
    itemsize = jnp.dtype(out_dtype).itemsize

    orig2d = orig_inp.reshape(-1, H)
    add2d = add_inp.reshape(-1, H)
    N = orig2d.shape[0]

    # Lane-dense (1, H) weight rows for the two halves of the concat Linear.
    w_o = weight[:, :H].astype(jnp.float32)      # (1, H)
    w_a = weight[:, H:].astype(jnp.float32)      # (1, H)
    b = bias.astype(jnp.float32).reshape(1)      # SMEM scalar

    # Live pipeline buffers: 2 streamed inputs (x2 or x3) + output (x2).
    n_buffers = 8 if _BUFFERED_OK else 6

    bytes_accessed = 3 * N * H * itemsize + (2 * H + 1) * 4
    compiler_params = pltpu.CompilerParams(
        dimension_semantics=("parallel",),
        vmem_limit_bytes=32 * 1024 * 1024,       # <= physical VMEM on v5e/v6e/v7x
    )

    packed = (H < 128) and (128 % H == 0) and ((N * H) % 128 == 0)

    if packed:
        r = 128 // H                              # logical rows per lane row
        n_rows = (N * H) // 128
        orig_p = orig2d.reshape(n_rows, 128)      # free, row-major reshape
        add_p = add2d.reshape(n_rows, 128)
        w_o_p = jnp.tile(w_o, (1, r))             # (1, 128)
        w_a_p = jnp.tile(w_a, (1, r))             # (1, 128)
        seg_id = jnp.arange(128) // H
        # 0/1 block-diagonal segment-sum matrix; bf16 keeps it exact and makes
        # each MXU pass a single-pass bf16 matmul (critical on v5e).
        seg = (seg_id[:, None] == seg_id[None, :]).astype(jnp.bfloat16)  # (128,128)

        tile = _pick_tile_rows(n_rows, 128, itemsize,
                               vmem_budget_bytes=vmem_budget_bytes,
                               n_buffers=n_buffers)
        steps = pl.cdiv(n_rows, tile)
        grid = (steps,)
        depth = 3 if steps > 2 else None          # extra pipeline depth (v7x)
        cost = pl.CostEstimate(
            flops=int(n_rows * 128 * (2 * 2 * 128 + 12)),   # two bf16 seg matmuls + VPU
            transcendentals=int(n_rows * 128),               # sigmoid per packed lane
            bytes_accessed=int(bytes_accessed),
        )

        out = pl.pallas_call(
            _gate_kernel_packed,
            out_shape=jax.ShapeDtypeStruct((n_rows, 128), out_dtype),
            grid_spec=pltpu.PrefetchScalarGridSpec(
                num_scalar_prefetch=0,
                grid=grid,
                in_specs=[
                    pl.BlockSpec(memory_space=pltpu.MemorySpace.SMEM),   # bias
                    _streaming_spec((tile, 128), lambda i: (i, 0), depth),  # orig rows
                    _streaming_spec((tile, 128), lambda i: (i, 0), depth),  # add rows
                    pl.BlockSpec((1, 128), lambda i: (0, 0)),            # w_o (resident)
                    pl.BlockSpec((1, 128), lambda i: (0, 0)),            # w_a (resident)
                    pl.BlockSpec((128, 128), lambda i: (0, 0)),          # segment-sum mat
                ],
                out_specs=pl.BlockSpec((tile, 128), lambda i: (i, 0)),
            ),
            compiler_params=compiler_params,
            cost_estimate=cost,
        )(b, orig_p, add_p, w_o_p, w_a_p, seg)
        return out.reshape(*lead_shape, H)

    # General path (H >= 128, or packing not applicable).
    n_rows = N
    tile = _pick_tile_rows(n_rows, H, itemsize,
                           vmem_budget_bytes=vmem_budget_bytes,
                           n_buffers=n_buffers)
    steps = pl.cdiv(n_rows, tile)
    grid = (steps,)
    depth = 3 if steps > 2 else None
    cost = pl.CostEstimate(
        flops=int(8 * N * H),
        transcendentals=int(N),
        bytes_accessed=int(bytes_accessed),
    )

    out = pl.pallas_call(
        _gate_kernel_rows,
        out_shape=jax.ShapeDtypeStruct((n_rows, H), out_dtype),
        grid_spec=pltpu.PrefetchScalarGridSpec(
            num_scalar_prefetch=0,
            grid=grid,
            in_specs=[
                pl.BlockSpec(memory_space=pltpu.MemorySpace.SMEM),       # bias
                _streaming_spec((tile, H), lambda i: (i, 0), depth),     # orig rows
                _streaming_spec((tile, H), lambda i: (i, 0), depth),     # add rows
                pl.BlockSpec((1, H), lambda i: (0, 0)),                  # w_o (resident)
                pl.BlockSpec((1, H), lambda i: (0, 0)),                  # w_a (resident)
            ],
            out_specs=pl.BlockSpec((tile, H), lambda i: (i, 0)),
        ),
        compiler_params=compiler_params,
        cost_estimate=cost,
    )(b, orig2d, add2d, w_o, w_a)
    return out.reshape(*lead_shape, H)


# ----------------------------- reference / demo ----------------------------- #

def gate_net_reference(orig_inp, add_inp, weight, bias):
    """Pure-JAX reference matching the PyTorch forward."""
    x = jnp.concatenate([orig_inp, add_inp], axis=-1)
    gate = jax.nn.sigmoid(x @ weight.T + bias)
    return gate * orig_inp + (1.0 - gate) * add_inp


if __name__ == "__main__":
    hidden_size = 32
    batch, seq = 2, 8

    key = jax.random.PRNGKey(0)
    k_orig, k_add, k_w, k_b = jax.random.split(key, 4)

    orig_inp = jax.random.normal(k_orig, (batch, seq, hidden_size), dtype=jnp.float32)
    add_inp = jax.random.normal(k_add, (batch, seq, hidden_size), dtype=jnp.float32)

    # Deterministic Linear(2H, 1) params (PyTorch-style uniform bound 1/sqrt(fan_in)).
    bound = 1.0 / jnp.sqrt(2.0 * hidden_size)
    weight = jax.random.uniform(k_w, (1, 2 * hidden_size), jnp.float32, -bound, bound)
    bias = jax.random.uniform(k_b, (1,), jnp.float32, -bound, bound)

    out = gate_net_pallas(orig_inp, add_inp, weight, bias)
    out = jax.block_until_ready(out)

    ref = gate_net_reference(orig_inp, add_inp, weight, bias)
    assert out.shape == (batch, seq, hidden_size)
    assert jnp.allclose(out, ref, atol=1e-5, rtol=1e-5), "mismatch vs reference"

    print("KERNEL_OK")
</pallas_src>

<mosaic_0001>
module attributes {stable_mosaic.version = 11 : i64} {
  func.func @_gate_kernel_packed(%arg0: i32, %arg1: memref<1xf32, #tpu.memory_space<smem>>, %arg2: memref<4x128xf32, #tpu.memory_space<vmem>>, %arg3: memref<4x128xf32, #tpu.memory_space<vmem>>, %arg4: memref<1x128xf32, #tpu.memory_space<vmem>>, %arg5: memref<1x128xf32, #tpu.memory_space<vmem>>, %arg6: memref<128x128xbf16, #tpu.memory_space<vmem>>, %arg7: memref<4x128xf32, #tpu.memory_space<vmem>>) attributes {dimension_semantics = [#tpu.dimension_semantics<parallel>], iteration_bounds = array<i64: 1>, scalar_prefetch = 0 : i64, scratch_operands = 0 : i64, tpu.core_type = #tpu.core_type<tc>, window_params = [{transform_indices = @transform_0, window_bounds = array<i64: 1>}, {transform_indices = @transform_1, window_bounds = array<i64: 4, 128>}, {transform_indices = @transform_2, window_bounds = array<i64: 4, 128>}, {pipeline_mode = #tpu.pipeline_mode<synchronous>, transform_indices = @transform_3, window_bounds = array<i64: 1, 128>}, {pipeline_mode = #tpu.pipeline_mode<synchronous>, transform_indices = @transform_4, window_bounds = array<i64: 1, 128>}, {pipeline_mode = #tpu.pipeline_mode<synchronous>, transform_indices = @transform_5, window_bounds = array<i64: 128, 128>}, {transform_indices = @transform_6, window_bounds = array<i64: 4, 128>}]} {
    %c0 = arith.constant 0 : index
    %c0_0 = arith.constant 0 : index
    %0 = vector.load %arg2[%c0, %c0_0] : memref<4x128xf32, #tpu.memory_space<vmem>>, vector<4x128xf32>
    %c0_1 = arith.constant 0 : index
    %c0_2 = arith.constant 0 : index
    %1 = vector.load %arg3[%c0_1, %c0_2] : memref<4x128xf32, #tpu.memory_space<vmem>>, vector<4x128xf32>
    %c0_3 = arith.constant 0 : index
    %c0_4 = arith.constant 0 : index
    %2 = vector.load %arg4[%c0_3, %c0_4] : memref<1x128xf32, #tpu.memory_space<vmem>>, vector<1x128xf32>
    %3 = vector.broadcast %2 : vector<1x128xf32> to vector<4x128xf32>
    %4 = arith.mulf %0, %3 : vector<4x128xf32>
    %c0_5 = arith.constant 0 : index
    %c0_6 = arith.constant 0 : index
    %5 = vector.load %arg5[%c0_5, %c0_6] : memref<1x128xf32, #tpu.memory_space<vmem>>, vector<1x128xf32>
    %6 = vector.broadcast %5 : vector<1x128xf32> to vector<4x128xf32>
    %7 = arith.mulf %1, %6 : vector<4x128xf32>
    %8 = arith.addf %4, %7 : vector<4x128xf32>
    %9 = arith.truncf %8 : vector<4x128xf32> to vector<4x128xbf16>
    %10 = arith.extf %9 : vector<4x128xbf16> to vector<4x128xf32>
    %11 = arith.subf %8, %10 : vector<4x128xf32>
    %12 = arith.truncf %11 : vector<4x128xf32> to vector<4x128xbf16>
    %c0_7 = arith.constant 0 : index
    %c0_8 = arith.constant 0 : index
    %13 = vector.load %arg6[%c0_7, %c0_8] : memref<128x128xbf16, #tpu.memory_space<vmem>>, vector<128x128xbf16>
    %cst = arith.constant dense<0.000000e+00> : vector<4x128xf32>
    %14 = tpu.matmul %9, %13, %cst {dimension_numbers = #tpu.dot_dimension_numbers<[1], [0], [0], [1], [0, 0, 1, 1], [], []>} : vector<4x128xbf16>, vector<128x128xbf16>, vector<4x128xf32> -> vector<4x128xf32>
    %cst_9 = arith.constant dense<0.000000e+00> : vector<4x128xf32>
    %15 = tpu.matmul %12, %13, %cst_9 {dimension_numbers = #tpu.dot_dimension_numbers<[1], [0], [0], [1], [0, 0, 1, 1], [], []>} : vector<4x128xbf16>, vector<128x128xbf16>, vector<4x128xf32> -> vector<4x128xf32>
    %16 = arith.addf %14, %15 : vector<4x128xf32>
    %c0_10 = arith.constant 0 : index
    %17 = memref.load %arg1[%c0_10] : memref<1xf32, #tpu.memory_space<smem>>
    %18 = vector.broadcast %17 : f32 to vector<4x128xf32>
    %19 = arith.addf %16, %18 : vector<4x128xf32>
    %20 = arith.negf %19 : vector<4x128xf32>
    %21 = math.exp %20 : vector<4x128xf32>
    %cst_11 = arith.constant 1.000000e+00 : f32
    %22 = vector.broadcast %cst_11 : f32 to vector<4x128xf32>
    %23 = arith.addf %22, %21 : vector<4x128xf32>
    %24 = arith.divf %22, %23 : vector<4x128xf32>
    %25 = arith.subf %0, %1 : vector<4x128xf32>
    %26 = arith.mulf %24, %25 : vector<4x128xf32>
    %27 = arith.addf %1, %26 : vector<4x128xf32>
    %c0_12 = arith.constant 0 : index
    %c0_13 = arith.constant 0 : index
    %28 = vector.load %arg7[%c0_12, %c0_13] : memref<4x128xf32, #tpu.memory_space<vmem>>, vector<4x128xf32>
    tpu.vector_store %arg7[%c0_12, %c0_13], %27 {strides = array<i32>} : memref<4x128xf32, #tpu.memory_space<vmem>>, vector<4x128xf32>,
    return
  }
  func.func @transform_0(%arg0: i32) -> i32 {
    %c0_i32 = arith.constant 0 : i32
    %c0_i32_0 = arith.constant 0 : i32
    return %c0_i32 : i32
  }
  func.func @transform_1(%arg0: i32) -> (i32, i32) {
    %c0_i32 = arith.constant 0 : i32
    %c0_i32_0 = arith.constant 0 : i32
    return %arg0, %c0_i32 : i32, i32
  }
  func.func @transform_2(%arg0: i32) -> (i32, i32) {
    %c0_i32 = arith.constant 0 : i32
    %c0_i32_0 = arith.constant 0 : i32
    return %arg0, %c0_i32 : i32, i32
  }
  func.func @transform_3(%arg0: i32) -> (i32, i32) {
    %c0_i32 = arith.constant 0 : i32
    %c0_i32_0 = arith.constant 0 : i32
    %c0_i32_1 = arith.constant 0 : i32
    return %c0_i32, %c0_i32_0 : i32, i32
  }
  func.func @transform_4(%arg0: i32) -> (i32, i32) {
    %c0_i32 = arith.constant 0 : i32
    %c0_i32_0 = arith.constant 0 : i32
    %c0_i32_1 = arith.constant 0 : i32
    return %c0_i32, %c0_i32_0 : i32, i32
  }
  func.func @transform_5(%arg0: i32) -> (i32, i32) {
    %c0_i32 = arith.constant 0 : i32
    %c0_i32_0 = arith.constant 0 : i32
    %c0_i32_1 = arith.constant 0 : i32
    return %c0_i32, %c0_i32_0 : i32, i32
  }
  func.func @transform_6(%arg0: i32) -> (i32, i32) {
    %c0_i32 = arith.constant 0 : i32
    %c0_i32_0 = arith.constant 0 : i32
    return %arg0, %c0_i32 : i32, i32
  }
}

</mosaic_0001>

<bundles_post_ra>
// kernel: tpu_custom_call.1
= control target key start
LH: loop header
LB: loop body
LE: loop exit
PB: predicated region body
PF: predicated region fallthrough
CT: control target
= control target key end

     0   :  { %12 = vsyncpa [#allocation4], 0  ;;  %s505_s0 = inlined_call_operand.<no memory space> [shape: f32[1], index: 0, kind: input, shape index: {}]   ;;  %s506_s1 = inlined_call_operand.hbm [shape: f32[4,128], index: 1, kind: input, shape index: {}]   ;;  %s507_s2 = inlined_call_operand.vmem [shape: f32[4,128], index: 2, kind: input, shape index: {}]   ;;  %s508_s3 = inlined_call_operand.vmem [shape: f32[1,128], index: 3, kind: input, shape index: {}]   ;;  %s509_s4 = inlined_call_operand.vmem [shape: f32[1,128], index: 4, kind: input, shape index: {}]   ;;  %s510_s5 = inlined_call_operand.hbm [shape: bf16[128,128], index: 5, kind: input, shape index: {}]   ;;  %s511_s6 = inlined_call_operand.hbm [shape: f32[4,128], index: 6, kind: output, shape index: {}]  }
   0x1   :  { %13 = vsyncpa [#allocation7], 0 }
   0x2   :  { %14 = vsyncpa [#allocation5], 0  ;;  %s408_s21 = smov [#allocation3]   ;;  %s409_s23 = smov [#allocation6]  }
   0x3   :  { %s23_s22 = sshll.u32 %s408_s21, 4  ;;  %s38_s24 = sshll.u32 %s409_s23, 4  ;;  %s24_s22 = int_to_ptr.vmem [resolvable:$true] %s23_s22  ;;  %s450_s24 = int_to_ptr.vmem [resolvable:$true] %s38_s24 }
   0x4   :  { %s336_s27 = scalar_lea.hbm %s506_s1, 64 }
   0x5   :  { %p337_p0 = scmp.ne.s32.totalorder %s506_s1, %s336_s27  ;;  %p340_p1 = scmp.lt.u32.totalorder %s336_s27, %s506_s1 }
   0x7   :  { %p342_p2 = pnand %p340_p1, %p337_p0 }
   0x9   :  { %345 = shalt.err (!%p342_p2)
}
   0xa   :  { %s346_s8 = scalar_lea.vmem %s24_s22, 64  ;;  %p351_p4 = scmp.lt.s32.totalorder %s24_s22, %s24_s22 }
   0xb   :  { %p347_p3 = scmp.ne.s32.totalorder %s24_s22, %s346_s8  ;;  %p352_p5 = scmp.lt.s32.totalorder %s346_s8, %s346_s8 }
   0xd   :  { %p353_p6 = por %p352_p5, %p351_p4 }
   0xf   :  { %p354_p7 = pnand %p353_p6, %p347_p3 }
  0x11   :  { %357 = shalt.err (!%p354_p7)
}
  0x12   :  { %26 = dma.hbm_to_vmem [thread:$0]  %s506_s1, 64, %s24_s22, [#allocation4]  }
  0x13   :  { %s358_s13 = scalar_lea.hbm %s510_s5, 1024 }
  0x14   :  { %p359_p8 = scmp.ne.s32.totalorder %s510_s5, %s358_s13  ;;  %p362_p9 = scmp.lt.u32.totalorder %s358_s13, %s510_s5 }
  0x16   :  { %p364_p10 = pnand %p362_p9, %p359_p8 }
  0x18   :  { %367 = shalt.err (!%p364_p10)
}
  0x19   :  { %s368_s18 = scalar_lea.vmem %s450_s24, 1024  ;;  %p373_p12 = scmp.lt.s32.totalorder %s450_s24, %s450_s24 }
  0x1a   :  { %p369_p11 = scmp.ne.s32.totalorder %s450_s24, %s368_s18  ;;  %p374_p13 = scmp.lt.s32.totalorder %s368_s18, %s368_s18 }
  0x1c   :  { %p375_p0 = por %p374_p13, %p373_p12 }
  0x1e   :  { %p376_p1 = pnand %p375_p0, %p369_p11 }
  0x20   :  { %379 = shalt.err (!%p376_p1)
}
  0x21   :  { %s410_s1 = smov 64   ;;  %s411_s19 = smov 4  }
  0x22   :  { %44 = dma.hbm_to_vmem [thread:$0]  %s510_s5, 1024, %s450_s24, [#allocation7], %s410_s1, %s410_s1, %s411_s19  }
  0x23   :  { %402 = dma.done.wait [#allocation4], 64  }
  0x24   :  { %403 = vsyncadd [#allocation4], 4294967232 }
  0x25   :  { %404 = dma.done.wait [#allocation7], 1024  }
  0x26   :  { %405 = vsyncadd [#allocation7], 4294966272  ;;  %v412_v0 = vmov 0.0   ;;  %vm413_vm0 = vmmov 0   ;;  %v324_v1 = vld [vmem:[#allocation6] sm:$0xff]   ;;  %v325_v2 = vld [vmem:[#allocation6 + $0x8] sm:$0xff]   ;;  %v220_v22 = vstv %s505_s0 }
  0x27   :  { %277 = vmatprep.subr.bf16.mxu0 %v412_v0  ;;  %297 = vmatprep.subr.bf16.mxu1 %v412_v0  ;;  %v326_v3 = vld [vmem:[#allocation6 + $0x10] sm:$0xff]   ;;  %v52_v4 = vld [vmem:[#allocation3] sm:$0xf]  ;;  %v328_v12 = vld [vmem:[#allocation6 + $0x20] sm:$0xff]  }
  0x28   :  { %293 = vmatprep.mubr.msk.bf16.mxu0 %vm413_vm0, %v412_v0  ;;  %313 = vmatprep.mubr.msk.bf16.mxu1 %vm413_vm0, %v412_v0  ;;  %v53_v5 = vld [vmem:[%s507_s2] sm:$0xf]  ;;  %v329_v14 = vld [vmem:[#allocation6 + $0x28] sm:$0xff]   ;;  %v330_v16 = vld [vmem:[#allocation6 + $0x30] sm:$0xff]  }
  0x29   :  { %278 = vmatpush3.bf16.msra.mxu0 %v324_v1  ;;  %298 = vmatpush3.bf16.msra.mxu1 %v324_v1  ;;  %v248_v6 = vld [vmem:[%s508_s3] ss:$0 sm:$0xff]  ;;  %v228_v34 = vsub.f32 %v52_v4, %v53_v5 }
  0x2a   :  { %279 = vmatprep.subr.bf16.mxu0 %v412_v0  ;;  %299 = vmatprep.subr.bf16.mxu1 %v412_v0  ;;  %v61_v7 = vmul.f32 %v248_v6, %v52_v4  ;;  %v249_v8 = vld [vmem:[%s509_s4] ss:$0 sm:$0xff]  ;;  %s414_s4 = smov [#allocation8]  }
  0x2b   :  { %v327_v9 = vld [vmem:[#allocation6 + $0x18] sm:$0xff]   ;;  %v69_v10 = vmul.f32 %v249_v8, %v53_v5  ;;  %s238_s27 = sshll.u32 %s414_s4, 4  ;;  %s239_s27 = int_to_ptr.vmem [resolvable:$true] %s238_s27 }
  0x2c   :  { %v331_v18 = vld [vmem:[#allocation6 + $0x38] sm:$0xff]   ;;  %s380_s0 = scalar_lea.vmem %s239_s27, 64  ;;  %p385_p3 = scmp.lt.s32.totalorder %s239_s27, %s239_s27 }
  0x2d   :  { %280 = vmatpush3.bf16.msra.mxu0 %v325_v2  ;;  %300 = vmatpush3.bf16.msra.mxu1 %v325_v2  ;;  %v70_v11 = vadd.f32 %v69_v10, %v61_v7  ;;  %p381_p2 = scmp.ne.s32.totalorder %s239_s27, %s380_s0  ;;  %p386_p4 = scmp.lt.s32.totalorder %s380_s0, %s380_s0 }
  0x2e   :  { %281 = vmatprep.subr.bf16.mxu0 %v412_v0  ;;  %301 = vmatprep.subr.bf16.mxu1 %v412_v0 }
  0x2f   :  { %v71_v13 = vpack.c.bf16 %v70_v11, %v70_v11  ;;  %p387_p5 = por %p386_p4, %p385_p3 }
  0x31   :  { %282 = vmatpush3.bf16.msra.mxu0 %v326_v3  ;;  %302 = vmatpush3.bf16.msra.mxu1 %v326_v3  ;;  %v72_v15 = vunpack.c.l.bf16 %v71_v13  ;;  %p388_p6 = pnand %p387_p5, %p381_p2 }
  0x32   :  { %283 = vmatprep.subr.bf16.mxu0 %v412_v0  ;;  %303 = vmatprep.subr.bf16.mxu1 %v412_v0 }
  0x33   :  { %v73_v17 = vsub.f32 %v70_v11, %v72_v15 }
  0x35   :  { %284 = vmatpush3.bf16.msra.mxu0 %v327_v9  ;;  %304 = vmatpush3.bf16.msra.mxu1 %v327_v9  ;;  %v74_v19 = vpack.c.bf16 %v73_v17, %v73_v17 }
  0x36   :  { %285 = vmatprep.subr.bf16.mxu0 %v412_v0  ;;  %305 = vmatprep.subr.bf16.mxu1 %v412_v0 }
  0x39   :  { %286 = vmatpush3.bf16.msra.mxu0 %v328_v12  ;;  %306 = vmatpush3.bf16.msra.mxu1 %v328_v12 }
  0x3a   :  { %287 = vmatprep.subr.bf16.mxu0 %v412_v0  ;;  %307 = vmatprep.subr.bf16.mxu1 %v412_v0 }
  0x3d   :  { %288 = vmatpush3.bf16.msra.mxu0 %v329_v14  ;;  %308 = vmatpush3.bf16.msra.mxu1 %v329_v14 }
  0x3e   :  { %289 = vmatprep.subr.bf16.mxu0 %v412_v0  ;;  %309 = vmatprep.subr.bf16.mxu1 %v412_v0 }
  0x41   :  { %290 = vmatpush3.bf16.msra.mxu0 %v330_v16  ;;  %310 = vmatpush3.bf16.msra.mxu1 %v330_v16 }
  0x42   :  { %291 = vmatprep.subr.bf16.mxu0 %v412_v0  ;;  %311 = vmatprep.subr.bf16.mxu1 %v412_v0 }
  0x45   :  { %292 = vmatpush3.bf16.msra.mxu0 %v331_v18  ;;  %312 = vmatpush3.bf16.msra.mxu1 %v331_v18 }
  0x48   :  { %294 = vmatmul.mubr.bf16.vlgmr.msra.gmra.mrb[0].mxu0 %v74_v19  ;;  %314 = vmatmul.mubr.bf16.vlgmr.msra.gmra.mrb[0].mxu1 %v71_v13 }
 0x11b   :  { %v173_v20 = vpop.f32.mrb[0].mxu0  ;;  %v213_v21 = vpop.f32.mrb[0].mxu1 }
 0x11c   :  { %v214_v23 = vadd.f32 %v213_v21, %v173_v20  ;;  %v295_v24 = vpop.f32.mrb[1].mxu0  ;;  %v315_v25 = vpop.f32.mrb[1].mxu1 }
 0x11d   :  { %v176_v26 = vpop.f32.mrb[2].mxu0  ;;  %v216_v27 = vpop.f32.mrb[2].mxu1 }
 0x11e   :  { %v221_v28 = vadd.f32 %v220_v22, %v214_v23  ;;  %v296_v29 = vpop.f32.mrb[3].mxu0  ;;  %v316_v30 = vpop.f32.mrb[3].mxu1 }
 0x120   :  { %v258_v31 = vmul.f32 -1.442695, %v221_v28 }
 0x122   :  { %332 = vpow2.f32 %v258_v31 }
 0x12c   :  { %v333_v32 = vpop.eup %332 }
 0x12d   :  { %v225_v33 = vadd.f32 1.0, %v333_v32 }
 0x12f   :  { %334 = vrcp.f32 %v225_v33 }
 0x139   :  { %v335_v35 = vpop.eup %334 }
 0x13a   :  { %v229_v36 = vmul.f32 %v335_v35, %v228_v34 }
 0x13c   :  { %v230_v37 = vadd.f32 %v229_v36, %v53_v5 }
 0x13e   :  { %231 = vst [vmem:[#allocation8] sm:$0xf] %v230_v37 }
 0x13f   :  { %391 = shalt.err (!%p388_p6)
}
 0x140   :  { %s392_s30 = scalar_lea.hbm %s511_s6, 64 }
 0x141   :  { %p393_p7 = scmp.ne.s32.totalorder %s511_s6, %s392_s30  ;;  %p396_p8 = scmp.lt.u32.totalorder %s392_s30, %s511_s6 }
 0x143   :  { %p398_p9 = pnand %p396_p8, %p393_p7 }
 0x145   :  { %401 = shalt.err (!%p398_p9)
}
 0x146   :  { %241 = dma.vmem_to_hbm [thread:$0]  %s239_s27, 64, %s511_s6, [#allocation5]  }
 0x147   :  { %406 = dma.done.wait [#allocation5], 64  }
 0x148   :  { %407 = vsyncadd [#allocation5], 4294967232 }
 0x149   :  { %245 = vsyncpa [#allocation4], 1 }
 0x14a   :  { %246 = vsyncpa [#allocation7], 1 }
 0x14b   :  { %247 = vsyncpa [#allocation5], 1 }

</bundles_post_ra>
